<compile_context>
chip_gen: v7x
topology: tpu7x:2x2x1
jax: 0.10.0
libtpu: 0.0.40
codegen_flags: <defaults>
</compile_context>

<pallas_src>
import functools
import math

import jax
import jax.numpy as jnp
from jax.experimental import pallas as pl
from jax.experimental.pallas import tpu as pltpu


# ---------------------------------------------------------------------------
# Chip-aware tiling helpers
# ---------------------------------------------------------------------------

def _vmem_capacity_bytes() -> int:
    """Physical VMEM per TensorCore; conservative 64 MiB (v7x-class) fallback."""
    try:
        info = pltpu.get_tpu_info()
        cap = getattr(info, "vmem_capacity_bytes", None)
        if cap:
            return int(cap)
    except Exception:  # no TPU visible (e.g. interpret mode on CPU)
        pass
    return 64 << 20


def _budgets():
    """(tile_budget_bytes, tile_rows_cap, vmem_limit_cap) per chip generation."""
    cap = _vmem_capacity_bytes()
    if cap >= (100 << 20):                 # v5e / v6e: 128 MiB physical VMEM
        return 32 << 20, 2048, 48 << 20
    return 16 << 20, 1024, 32 << 20        # v7x-class: 64 MiB physical VMEM


def _sublane_multiple(dtype) -> int:
    itemsize = jnp.dtype(dtype).itemsize
    return max(8, 32 // itemsize)          # 8 for f32, 16 for bf16, 32 for int8


def _pick_tile_rows(lane, itemsize, n_rows, sub, budget, row_cap):
    """Largest row-tile whose double-buffered I/O blocks + f32 temps fit budget."""
    per_row = lane * (4 * itemsize + 16)   # 2x(in+out) blocks + ~4 live f32 temps
    t = max(sub, budget // per_row)
    t = min(t, row_cap)
    rows_rounded = -(-n_rows // sub) * sub
    t = min(t, rows_rounded)
    t = max(sub, (t // sub) * sub)
    return int(t)


def _vmem_limit(tile_rows, lane, itemsize, resident_bytes, limit_cap):
    blocks = 4 * tile_rows * lane * itemsize   # double-buffered in + out blocks
    temps = 4 * tile_rows * lane * 4           # f32 temporaries inside the kernel
    lim = blocks + temps + resident_bytes + (4 << 20)
    return int(min(max(lim, 16 << 20), limit_cap))


# ---------------------------------------------------------------------------
# Kernels
# ---------------------------------------------------------------------------

def _ln_kernel_rowmajor(x_ref, a_ref, b_ref, o_ref, *, eps, dim):
    """One logical row per physical row; reduction over the lane axis."""
    x = x_ref[...].astype(jnp.float32)                       # (tile_rows, dim)
    mu = jnp.mean(x, axis=-1, keepdims=True)
    diff = x - mu
    # torch.std default is the UNBIASED estimator (ddof=1); the module adds eps
    # to sigma (the std), not to the variance.  (dim==1 is degenerate in torch
    # too -- NaN std -- and is not supported here.)
    var = jnp.sum(diff * diff, axis=-1, keepdims=True) * (1.0 / max(dim - 1, 1))
    inv = 1.0 / (jnp.sqrt(var) + eps)                        # exact (was approx vrcp)
    out = diff * inv * a_ref[...].astype(jnp.float32) + b_ref[...].astype(jnp.float32)
    o_ref[...] = out.astype(o_ref.dtype)


def _ln_kernel_packed(x_ref, A_ref, a_ref, b_ref, o_ref, *, eps, dim):
    """g = lane // dim logical rows packed per lane-dense physical row.

    A is block-diagonal 0/1 (ones within each dim-wide segment): x @ A does the
    segmented reduce AND the broadcast back in a single MXU matmul, so only two
    matmuls are needed (mean, variance) instead of four.
    """
    x = x_ref[...].astype(jnp.float32)                       # (tile_rows, lane)
    A = A_ref[...]                                           # (lane, lane) 0/1 f32
    hi = jax.lax.Precision.HIGHEST
    # TODO(synk): per-operand precision (HIGHEST lhs / DEFAULT one-hot rhs) would
    # halve MXU passes again on v5e once mixed precision is exercised here.
    mu = jnp.dot(x, A, precision=hi,
                 preferred_element_type=jnp.float32) * (1.0 / dim)
    diff = x - mu
    var = jnp.dot(diff * diff, A, precision=hi,
                  preferred_element_type=jnp.float32) * (1.0 / max(dim - 1, 1))
    inv = 1.0 / (jnp.sqrt(var) + eps)                        # exact
    out = diff * inv * a_ref[...].astype(jnp.float32) + b_ref[...].astype(jnp.float32)
    o_ref[...] = out.astype(o_ref.dtype)


# ---------------------------------------------------------------------------
# Wrappers
# ---------------------------------------------------------------------------

def _layer_norm_rowmajor(x2, a_2, b_2, eps):
    rows, dim = x2.shape
    itemsize = jnp.dtype(x2.dtype).itemsize
    budget, row_cap, limit_cap = _budgets()
    sub = _sublane_multiple(x2.dtype)
    tile_rows = _pick_tile_rows(dim, itemsize, rows, sub, budget, row_cap)
    param_bytes = 2 * dim * jnp.dtype(a_2.dtype).itemsize

    kernel = functools.partial(_ln_kernel_rowmajor, eps=eps, dim=dim)
    return pl.pallas_call(
        kernel,
        out_shape=jax.ShapeDtypeStruct((rows, dim), x2.dtype),
        grid_spec=pltpu.PrefetchScalarGridSpec(
            num_scalar_prefetch=0,
            # cdiv grid + exact out_shape: Pallas masks the ragged last block,
            # so there is no jnp.pad / out[:rows] HBM round-trip anymore.
            grid=(pl.cdiv(rows, tile_rows),),
            in_specs=[
                pl.BlockSpec((tile_rows, dim), lambda i: (i, 0)),
                # Constant block index -> gamma/beta fetched once, kept resident.
                pl.BlockSpec((1, dim), lambda i: (0, 0)),
                pl.BlockSpec((1, dim), lambda i: (0, 0)),
            ],
            out_specs=pl.BlockSpec((tile_rows, dim), lambda i: (i, 0)),
        ),
        compiler_params=pltpu.CompilerParams(
            # TODO(synk): on v7x verify this axis is split across both
            # TensorCores; if not, switch to pltpu.CORE_PARALLEL here.
            dimension_semantics=("parallel",),
            vmem_limit_bytes=_vmem_limit(tile_rows, dim, itemsize,
                                         param_bytes, limit_cap),
        ),
        cost_estimate=pl.CostEstimate(
            flops=int(8 * rows * dim),
            transcendentals=int(2 * rows),
            bytes_accessed=int(2 * rows * dim * itemsize + param_bytes),
        ),
    )(x2, a_2.reshape(1, dim), b_2.reshape(1, dim))


def _layer_norm_packed(x2, a_2, b_2, eps, g):
    rows, dim = x2.shape
    lane = g * dim                       # multiple of 128: fully lane-dense I/O
    itemsize = jnp.dtype(x2.dtype).itemsize

    # Pad only to a multiple of g (needed for the metadata-only reshape); never
    # to a multiple of tile_rows*g.  Common case rows % g == 0 -> no copies.
    pad = (-rows) % g
    xp = x2 if pad == 0 else jnp.pad(x2, ((0, pad), (0, 0)))
    rows_p = rows + pad
    rows_grp = rows_p // g
    x3 = xp.reshape(rows_grp, lane)      # contiguous reshape: metadata only

    # Block-diagonal 0/1 matrix: ones within each dim-wide lane segment.
    seg = jnp.arange(lane, dtype=jnp.int32) // dim
    A = (seg[:, None] == seg[None, :]).astype(jnp.float32)
    a_t = jnp.tile(a_2.reshape(1, dim), (1, g))
    b_t = jnp.tile(b_2.reshape(1, dim), (1, g))

    budget, row_cap, limit_cap = _budgets()
    sub = _sublane_multiple(x2.dtype)
    tile_rows = _pick_tile_rows(lane, itemsize, rows_grp, sub, budget, row_cap)
    resident = lane * lane * 4 + 2 * lane * jnp.dtype(a_t.dtype).itemsize

    kernel = functools.partial(_ln_kernel_packed, eps=eps, dim=dim)
    out3 = pl.pallas_call(
        kernel,
        out_shape=jax.ShapeDtypeStruct((rows_grp, lane), x2.dtype),
        grid_spec=pltpu.PrefetchScalarGridSpec(
            num_scalar_prefetch=0,
            grid=(pl.cdiv(rows_grp, tile_rows),),
            in_specs=[
                pl.BlockSpec((tile_rows, lane), lambda i: (i, 0)),
                pl.BlockSpec((lane, lane), lambda i: (0, 0)),   # resident A
                pl.BlockSpec((1, lane), lambda i: (0, 0)),      # resident gamma
                pl.BlockSpec((1, lane), lambda i: (0, 0)),      # resident beta
            ],
            out_specs=pl.BlockSpec((tile_rows, lane), lambda i: (i, 0)),
        ),
        compiler_params=pltpu.CompilerParams(
            dimension_semantics=("parallel",),
            vmem_limit_bytes=_vmem_limit(tile_rows, lane, itemsize,
                                         resident, limit_cap),
        ),
        cost_estimate=pl.CostEstimate(
            flops=int(4 * rows_grp * lane * lane + 8 * rows_grp * lane),
            transcendentals=int(2 * rows_grp * lane),
            bytes_accessed=int(2 * rows_grp * lane * itemsize + resident),
        ),
    )(x3, A, a_t, b_t)

    out = out3.reshape(rows_p, dim)
    return out[:rows] if pad else out


def _packing_group(dim: int) -> int:
    """Logical rows packed per lane-dense physical row (1 => row-major path)."""
    if dim % 128 == 0:
        return 1                         # already lane-dense
    g = math.lcm(dim, 128) // dim
    if g * dim <= 1024:                  # keep the (lane, lane) 0/1 matrix small
        return g
    # TODO(synk): dims not a multiple of 128 with lcm(dim,128) > 1024 fall back
    # to the row-major path with a partially masked trailing lane-tile store.
    return 1


def layer_norm(x, a_2, b_2, *, eps=0.001):
    """LayerNorm over the last dim matching the PyTorch module semantics:
    unbiased std (ddof=1), eps added to sigma, then * a_2 + b_2."""
    orig_shape = x.shape
    dim = orig_shape[-1]
    x2 = x.reshape(-1, dim)              # metadata-only reshape
    g = _packing_group(dim)
    if g > 1:
        out = _layer_norm_packed(x2, a_2, b_2, eps, g)
    else:
        out = _layer_norm_rowmajor(x2, a_2, b_2, eps)
    return out.reshape(orig_shape)


# ---------------------------------------------------------------------------
# Demo / correctness check
# ---------------------------------------------------------------------------

def _reference(x, a_2, b_2, eps):
    mu = jnp.mean(x, axis=-1, keepdims=True)
    sigma = jnp.std(x, axis=-1, keepdims=True, ddof=1)   # unbiased, like torch.std
    return (x - mu) / (sigma + eps) * a_2 + b_2


if __name__ == "__main__":
    key = jax.random.PRNGKey(0)
    k1, k2, k3 = jax.random.split(key, 3)
    eps = 0.001
    tol = dict(atol=2e-3, rtol=2e-3)

    # Case 1: hidden=32 (<128) -> lane-dense packed path (g=4).
    batch, seq, hidden = 2, 8, 32
    x = jax.random.normal(k1, (batch, seq, hidden), dtype=jnp.float32)
    a_2 = jnp.ones((hidden,), dtype=jnp.float32)   # nn.Parameter(torch.ones(dim))
    b_2 = jnp.zeros((hidden,), dtype=jnp.float32)  # nn.Parameter(torch.zeros(dim))
    out = jax.block_until_ready(layer_norm(x, a_2, b_2, eps=eps))
    ref = _reference(x, a_2, b_2, eps)
    assert out.shape == x.shape
    assert jnp.allclose(out, ref, **tol), "packed-path mismatch vs reference"

    # Case 2: hidden=128 (multiple of 128) -> row-major path (already lane dense).
    hidden2 = 128
    x_w = jax.random.normal(k2, (batch, seq, hidden2), dtype=jnp.float32)
    a_w = 0.5 + 0.01 * jnp.arange(hidden2, dtype=jnp.float32)
    b_w = 0.1 * jnp.ones((hidden2,), dtype=jnp.float32)
    out_w = jax.block_until_ready(layer_norm(x_w, a_w, b_w, eps=eps))
    ref_w = _reference(x_w, a_w, b_w, eps)
    assert jnp.allclose(out_w, ref_w, **tol), "row-major-path mismatch vs reference"

    # Case 3: hidden=96 (not a divisor of 128) with ragged rows -> generalized
    # packing (g=4, lane=384) plus a ragged last block and a small row pad.
    x_g = jax.random.normal(k3, (3, 6, 96), dtype=jnp.float32)   # rows=18
    a_g = 1.0 + 0.02 * jnp.arange(96, dtype=jnp.float32)
    b_g = -0.05 * jnp.ones((96,), dtype=jnp.float32)
    out_g = jax.block_until_ready(layer_norm(x_g, a_g, b_g, eps=eps))
    ref_g = _reference(x_g, a_g, b_g, eps)
    assert jnp.allclose(out_g, ref_g, **tol), "generalized-packed mismatch vs reference"

    print("KERNEL_OK")
</pallas_src>

<mosaic_0001>
module attributes {stable_mosaic.version = 11 : i64} {
  func.func @_ln_kernel_packed(%arg0: i32, %arg1: memref<8x128xf32, #tpu.memory_space<vmem>>, %arg2: memref<128x128xf32, #tpu.memory_space<vmem>>, %arg3: memref<1x128xf32, #tpu.memory_space<vmem>>, %arg4: memref<1x128xf32, #tpu.memory_space<vmem>>, %arg5: memref<8x128xf32, #tpu.memory_space<vmem>>) attributes {dimension_semantics = [#tpu.dimension_semantics<parallel>], iteration_bounds = array<i64: 1>, scalar_prefetch = 0 : i64, scratch_operands = 0 : i64, tpu.core_type = #tpu.core_type<tc>, window_params = [{transform_indices = @transform_0, window_bounds = array<i64: 8, 128>}, {pipeline_mode = #tpu.pipeline_mode<synchronous>, transform_indices = @transform_1, window_bounds = array<i64: 128, 128>}, {pipeline_mode = #tpu.pipeline_mode<synchronous>, transform_indices = @transform_2, window_bounds = array<i64: 1, 128>}, {pipeline_mode = #tpu.pipeline_mode<synchronous>, transform_indices = @transform_3, window_bounds = array<i64: 1, 128>}, {transform_indices = @transform_4, window_bounds = array<i64: 8, 128>}]} {
    %c0 = arith.constant 0 : index
    %c0_0 = arith.constant 0 : index
    %0 = vector.load %arg1[%c0, %c0_0] : memref<8x128xf32, #tpu.memory_space<vmem>>, vector<8x128xf32>
    %c0_1 = arith.constant 0 : index
    %c0_2 = arith.constant 0 : index
    %1 = vector.load %arg2[%c0_1, %c0_2] : memref<128x128xf32, #tpu.memory_space<vmem>>, vector<128x128xf32>
    %cst = arith.constant dense<0.000000e+00> : vector<8x128xf32>
    %2 = tpu.matmul %0, %1, %cst {dimension_numbers = #tpu.dot_dimension_numbers<[1], [0], [0], [1], [0, 0, 1, 1], [], []>, precision = #tpu.contract_precision<fp32>} : vector<8x128xf32>, vector<128x128xf32>, vector<8x128xf32> -> vector<8x128xf32>
    %cst_3 = arith.constant 3.125000e-02 : f32
    %3 = vector.broadcast %cst_3 : f32 to vector<8x128xf32>
    %4 = arith.mulf %2, %3 : vector<8x128xf32>
    %5 = arith.subf %0, %4 : vector<8x128xf32>
    %6 = arith.mulf %5, %5 : vector<8x128xf32>
    %cst_4 = arith.constant dense<0.000000e+00> : vector<8x128xf32>
    %7 = tpu.matmul %6, %1, %cst_4 {dimension_numbers = #tpu.dot_dimension_numbers<[1], [0], [0], [1], [0, 0, 1, 1], [], []>, precision = #tpu.contract_precision<fp32>} : vector<8x128xf32>, vector<128x128xf32>, vector<8x128xf32> -> vector<8x128xf32>
    %cst_5 = arith.constant 0.0322580636 : f32
    %8 = vector.broadcast %cst_5 : f32 to vector<8x128xf32>
    %9 = arith.mulf %7, %8 : vector<8x128xf32>
    %10 = math.sqrt %9 : vector<8x128xf32>
    %cst_6 = arith.constant 1.000000e-03 : f32
    %11 = vector.broadcast %cst_6 : f32 to vector<8x128xf32>
    %12 = arith.addf %10, %11 : vector<8x128xf32>
    %cst_7 = arith.constant 1.000000e+00 : f32
    %13 = vector.broadcast %cst_7 : f32 to vector<8x128xf32>
    %14 = arith.divf %13, %12 : vector<8x128xf32>
    %15 = arith.mulf %5, %14 : vector<8x128xf32>
    %c0_8 = arith.constant 0 : index
    %c0_9 = arith.constant 0 : index
    %16 = vector.load %arg3[%c0_8, %c0_9] : memref<1x128xf32, #tpu.memory_space<vmem>>, vector<1x128xf32>
    %17 = vector.broadcast %16 : vector<1x128xf32> to vector<8x128xf32>
    %18 = arith.mulf %15, %17 : vector<8x128xf32>
    %c0_10 = arith.constant 0 : index
    %c0_11 = arith.constant 0 : index
    %19 = vector.load %arg4[%c0_10, %c0_11] : memref<1x128xf32, #tpu.memory_space<vmem>>, vector<1x128xf32>
    %20 = vector.broadcast %19 : vector<1x128xf32> to vector<8x128xf32>
    %21 = arith.addf %18, %20 : vector<8x128xf32>
    %c0_12 = arith.constant 0 : index
    %c0_13 = arith.constant 0 : index
    %22 = vector.load %arg5[%c0_12, %c0_13] : memref<8x128xf32, #tpu.memory_space<vmem>>, vector<8x128xf32>
    tpu.vector_store %arg5[%c0_12, %c0_13], %21 {strides = array<i32>} : memref<8x128xf32, #tpu.memory_space<vmem>>, vector<8x128xf32>,
    return
  }
  func.func @transform_0(%arg0: i32) -> (i32, i32) {
    %c0_i32 = arith.constant 0 : i32
    %c0_i32_0 = arith.constant 0 : i32
    return %arg0, %c0_i32 : i32, i32
  }
  func.func @transform_1(%arg0: i32) -> (i32, i32) {
    %c0_i32 = arith.constant 0 : i32
    %c0_i32_0 = arith.constant 0 : i32
    %c0_i32_1 = arith.constant 0 : i32
    return %c0_i32, %c0_i32_0 : i32, i32
  }
  func.func @transform_2(%arg0: i32) -> (i32, i32) {
    %c0_i32 = arith.constant 0 : i32
    %c0_i32_0 = arith.constant 0 : i32
    %c0_i32_1 = arith.constant 0 : i32
    return %c0_i32, %c0_i32_0 : i32, i32
  }
  func.func @transform_3(%arg0: i32) -> (i32, i32) {
    %c0_i32 = arith.constant 0 : i32
    %c0_i32_0 = arith.constant 0 : i32
    %c0_i32_1 = arith.constant 0 : i32
    return %c0_i32, %c0_i32_0 : i32, i32
  }
  func.func @transform_4(%arg0: i32) -> (i32, i32) {
    %c0_i32 = arith.constant 0 : i32
    %c0_i32_0 = arith.constant 0 : i32
    return %arg0, %c0_i32 : i32, i32
  }
}

</mosaic_0001>

<bundles_post_ra>
// kernel: tpu_custom_call.1
= control target key start
LH: loop header
LB: loop body
LE: loop exit
PB: predicated region body
PF: predicated region fallthrough
CT: control target
= control target key end

     0   :  { %9 = vsyncpa [#allocation3], 0  ;;  %s2889_s0 = inlined_call_operand.hbm [shape: f32[4,128], index: 0, kind: input, shape index: {}]   ;;  %s2890_s1 = inlined_call_operand.hbm [shape: f32[128,128], index: 1, kind: input, shape index: {}]   ;;  %s2891_s2 = inlined_call_operand.vmem [shape: f32[1,128], index: 2, kind: input, shape index: {}]   ;;  %s2892_s3 = inlined_call_operand.vmem [shape: f32[1,128], index: 3, kind: input, shape index: {}]   ;;  %s2893_s4 = inlined_call_operand.hbm [shape: f32[4,128], index: 4, kind: output, shape index: {}]  }
   0x1   :  { %10 = vsyncpa [#allocation6], 0 }
   0x2   :  { %11 = vsyncpa [#allocation4], 0 }
   0x3   :  { %16 = vsyncadd [#allocation3], 64  ;;  %s2415_s15 = smov [#allocation2]   ;;  %s2343_s19 = scalar_lea.hbm %s2889_s0, 64 }
   0x4   :  { %s17_s16 = sshll.u32 %s2415_s15, 4  ;;  %p2344_p0 = scmp.ne.s32.totalorder %s2889_s0, %s2343_s19  ;;  %s18_s16 = int_to_ptr.vmem [resolvable:$true] %s17_s16 }
   0x5   :  { %p2347_p1 = scmp.lt.u32.totalorder %s2343_s19, %s2889_s0 }
   0x7   :  { %p2349_p2 = pnand %p2347_p1, %p2344_p0 }
   0x9   :  { %2352 = shalt.err (!%p2349_p2)
}
   0xa   :  { %s2353_s24 = scalar_lea.vmem %s18_s16, 64  ;;  %s2357_s25 = scalar_lea.vmem %s18_s16, 128 }
   0xb   :  { %p2354_p3 = scmp.ne.s32.totalorder %s18_s16, %s2353_s24  ;;  %p2358_p4 = scmp.lt.s32.totalorder %s18_s16, %s18_s16 }
   0xc   :  { %p2359_p5 = scmp.lt.s32.totalorder %s2357_s25, %s2353_s24 }
   0xe   :  { %p2360_p6 = por %p2359_p5, %p2358_p4 }
  0x10   :  { %p2361_p7 = pnand %p2360_p6, %p2354_p3 }
  0x12   :  { %2364 = shalt.err (!%p2361_p7)
}
  0x13   :  { %s2416_s26 = smov 64   ;;  %s2417_s27 = smov 4  }
  0x14   :  { %23 = dma.hbm_to_vmem [thread:$0]  %s2889_s0, 64, %s18_s16, [#allocation3], %s2416_s26, %s2416_s26, %s2417_s27  }
  0x15   :  { %s2418_s30 = smov [#allocation5]   ;;  %s2365_s8 = scalar_lea.hbm %s2890_s1, 2048 }
  0x16   :  { %s29_s5 = sshll.u32 %s2418_s30, 4  ;;  %p2366_p8 = scmp.ne.s32.totalorder %s2890_s1, %s2365_s8  ;;  %s30_s5 = int_to_ptr.vmem [resolvable:$true] %s29_s5 }
  0x17   :  { %p2369_p9 = scmp.lt.u32.totalorder %s2365_s8, %s2890_s1 }
  0x19   :  { %p2371_p10 = pnand %p2369_p9, %p2366_p8 }
  0x1b   :  { %2374 = shalt.err (!%p2371_p10)
}
  0x1c   :  { %s2375_s13 = scalar_lea.vmem %s30_s5, 2048  ;;  %p2380_p12 = scmp.lt.s32.totalorder %s30_s5, %s30_s5 }
  0x1d   :  { %p2376_p11 = scmp.ne.s32.totalorder %s30_s5, %s2375_s13  ;;  %p2381_p13 = scmp.lt.s32.totalorder %s2375_s13, %s2375_s13 }
  0x1f   :  { %p2382_p0 = por %p2381_p13, %p2380_p12 }
  0x21   :  { %p2383_p1 = pnand %p2382_p0, %p2376_p11 }
  0x23   :  { %2386 = shalt.err (!%p2383_p1)
}
  0x24   :  { %s2419_s0 = smov 128   ;;  %s2420_s14 = smov 8  }
  0x25   :  { %35 = dma.hbm_to_vmem [thread:$0]  %s2890_s1, 2048, %s30_s5, [#allocation6], %s2419_s0, %s2419_s0, %s2420_s14  }
  0x26   :  { %2409 = dma.done.wait [#allocation3], 128  }
  0x27   :  { %2410 = vsyncadd [#allocation3], 4294967168 }
  0x28   :  { %2411 = dma.done.wait [#allocation6], 2048  }
  0x29   :  { %2412 = vsyncadd [#allocation6], 4294965248  ;;  %v2421_v0 = vmov 0.0|0.0   ;;  %vm2422_vm0 = vmmov 0   ;;  %v2423_v1 = vmov 0.0   ;;  %v47_v2 = vld [vmem:[#allocation5] sm:$0xff] }
  0x2a   :  { %2021 = vmatprep.subr.bf16.mxu0 %v2421_v0  ;;  %1633 = vmatprep.mubr.msk.f32.mxu0 %vm2422_vm0, %v2423_v1  ;;  %v48_v3 = vld [vmem:[#allocation5 + $0x8] sm:$0xff]  ;;  %v49_v4 = vld [vmem:[#allocation5 + $0x10] sm:$0xff]  ;;  %v64_v5 = vand.u32 4294901760, %v47_v2  ;;  %v50_v7 = vld [vmem:[#allocation5 + $0x18] sm:$0xff] }
  0x2b   :  { %2165 = vmatprep.subr.bf16.mxu1 %v2421_v0  ;;  %1843 = vmatprep.mubr.msk.f32.mxu1 %vm2422_vm0, %v2423_v1  ;;  %v67_v6 = vand.u32 4294901760, %v48_v3  ;;  %v70_v8 = vand.u32 4294901760, %v49_v4  ;;  %v73_v9 = vand.u32 4294901760, %v50_v7  ;;  %v51_v10 = vld [vmem:[#allocation5 + $0x20] sm:$0xff]  ;;  %v52_v11 = vld [vmem:[#allocation5 + $0x28] sm:$0xff]  ;;  %v53_v16 = vld [vmem:[#allocation5 + $0x30] sm:$0xff] }
  0x2c   :  { %v76_v14 = vand.u32 4294901760, %v51_v10  ;;  %v79_v15 = vand.u32 4294901760, %v52_v11  ;;  %v54_v17 = vld [vmem:[#allocation5 + $0x38] sm:$0xff]  ;;  %v82_v19 = vand.u32 4294901760, %v53_v16  ;;  %v55_v21 = vld [vmem:[#allocation5 + $0x40] sm:$0xff]  ;;  %v56_v23 = vld [vmem:[#allocation5 + $0x48] sm:$0xff]  ;;  %v2505_v34 = vsub.f32 %v47_v2, %v64_v5 }
  0x2d   :  { %v2483_v12 = vpack.c.bf16 %v67_v6, %v64_v5  ;;  %v2486_v13 = vpack.c.bf16 %v73_v9, %v70_v8  ;;  %v85_v20 = vand.u32 4294901760, %v54_v17  ;;  %v2494_v22 = vld [vmem:[#allocation2] sm:$0xff]  ;;  %v57_v24 = vld [vmem:[#allocation5 + $0x50] sm:$0xff]  ;;  %v59_v26 = vld [vmem:[#allocation5 + $0x60] sm:$0xff]  ;;  %v88_v27 = vand.u32 4294901760, %v55_v21 }
  0x2e   :  { %v2492_v18 = vpack.c.bf16 %v79_v15, %v76_v14  ;;  %v58_v25 = vld [vmem:[#allocation5 + $0x58] sm:$0xff]  ;;  %v60_v28 = vld [vmem:[#allocation5 + $0x68] sm:$0xff]  ;;  %v61_v29 = vld [vmem:[#allocation5 + $0x70] sm:$0xff]  ;;  %v2500_v31 = vand.u32 4294901760, %v2494_v22  ;;  %v91_v33 = vand.u32 4294901760, %v56_v23  ;;  %v2507_v35 = vsub.f32 %v48_v3, %v67_v6 }
  0x2f   :  { %2023 = vmatpush3.bf16.msra.mxu0 %v2483_v12  ;;  %2167 = vmatpush3.bf16.msra.mxu1 %v2483_v12  ;;  %v62_v30 = vld [vmem:[#allocation5 + $0x78] sm:$0xff]  ;;  %v2503_v32 = vpack.c.bf16 %v85_v20, %v82_v19  ;;  %v94_v36 = vand.u32 4294901760, %v57_v24  ;;  %v97_v37 = vand.u32 4294901760, %v58_v25  ;;  %v100_v38 = vand.u32 4294901760, %v59_v26 }
  0x30   :  { %2024 = vmatprep.subr.bf16.mxu0 %v2421_v0  ;;  %2168 = vmatprep.subr.bf16.mxu1 %v2421_v0  ;;  %v103_v39 = vand.u32 4294901760, %v60_v28  ;;  %v106_v40 = vand.u32 4294901760, %v61_v29  ;;  %v109_v41 = vand.u32 4294901760, %v62_v30  ;;  %v2514_v42 = vsub.f32 %v2494_v22, %v2500_v31 }
  0x31   :  { %v2516_v43 = vsub.f32 %v49_v4, %v70_v8  ;;  %v2519_v44 = vpack.c.bf16 %v91_v33, %v88_v27  ;;  %v157_v45 = vand.u32 4294901760, %v2505_v34  ;;  %v164_v46 = vand.u32 4294901760, %v2507_v35 }
  0x32   :  { %v2523_v47 = vsub.f32 %v50_v7, %v73_v9  ;;  %v2527_v48 = vsub.f32 %v51_v10, %v76_v14  ;;  %v2530_v49 = vpack.c.bf16 %v97_v37, %v94_v36  ;;  %v2532_v50 = vpack.c.bf16 %v103_v39, %v100_v38 }
  0x33   :  { %2026 = vmatpush3.bf16.msra.mxu0 %v2486_v13  ;;  %2170 = vmatpush3.bf16.msra.mxu1 %v2486_v13  ;;  %v2534_v51 = vpack.c.bf16 %v109_v41, %v106_v40  ;;  %v146_v52 = vand.u32 4294901760, %v2514_v42  ;;  %v171_v53 = vand.u32 4294901760, %v2516_v43  ;;  %v2538_v54 = vsub.f32 %v52_v11, %v79_v15 }
  0x34   :  { %2027 = vmatprep.subr.bf16.mxu0 %v2421_v0  ;;  %2171 = vmatprep.subr.bf16.mxu1 %v2421_v0  ;;  %v2540_v55 = vsub.f32 %v53_v16, %v82_v19  ;;  %v158_v56 = vsub.f32 %v2505_v34, %v157_v45  ;;  %v165_v57 = vsub.f32 %v2507_v35, %v164_v46  ;;  %v178_v58 = vand.u32 4294901760, %v2523_v47 }
  0x35   :  { %v2546_v59 = vsub.f32 %v54_v17, %v85_v20  ;;  %v185_v60 = vand.u32 4294901760, %v2527_v48  ;;  %v2551_v61 = vsub.f32 %v55_v21, %v88_v27  ;;  %v2553_v62 = vsub.f32 %v56_v23, %v91_v33 }
  0x36   :  { %v2555_v63 = vsub.f32 %v57_v24, %v94_v36  ;;  %v2558_v2 = vsub.f32 %v58_v25, %v97_v37  ;;  %v2560_v3 = vsub.f32 %v59_v26, %v100_v38  ;;  %v2562_v4 = vsub.f32 %v60_v28, %v103_v39 }
  0x37   :  { %2029 = vmatpush3.bf16.msra.mxu0 %v2492_v18  ;;  %2173 = vmatpush3.bf16.msra.mxu1 %v2492_v18  ;;  %v2564_v5 = vsub.f32 %v61_v29, %v106_v40  ;;  %v147_v6 = vsub.f32 %v2514_v42, %v146_v52  ;;  %v172_v7 = vsub.f32 %v2516_v43, %v171_v53  ;;  %v192_v8 = vand.u32 4294901760, %v2538_v54 }
  0x38   :  { %2030 = vmatprep.subr.bf16.mxu0 %v2421_v0  ;;  %2174 = vmatprep.subr.bf16.mxu1 %v2421_v0  ;;  %v2571_v9 = vsub.f32 %v62_v30, %v109_v41  ;;  %v159_v10 = vand.u32 4294901760, %v158_v56  ;;  %v166_v11 = vand.u32 4294901760, %v165_v57  ;;  %v179_v14 = vsub.f32 %v2523_v47, %v178_v58 }
  0x39   :  { %v199_v15 = vand.u32 4294901760, %v2540_v55  ;;  %v206_v16 = vand.u32 4294901760, %v2546_v59  ;;  %v213_v17 = vand.u32 4294901760, %v2551_v61  ;;  %v220_v19 = vand.u32 4294901760, %v2553_v62 }
  0x3a   :  { %v227_v20 = vand.u32 4294901760, %v2555_v63  ;;  %v234_v21 = vand.u32 4294901760, %v2558_v2  ;;  %v241_v23 = vand.u32 4294901760, %v2560_v3  ;;  %v248_v24 = vand.u32 4294901760, %v2562_v4 }
  0x3b   :  { %2032 = vmatpush3.bf16.msra.mxu0 %v2503_v32  ;;  %2176 = vmatpush3.bf16.msra.mxu1 %v2503_v32  ;;  %v255_v25 = vand.u32 4294901760, %v2564_v5  ;;  %v262_v26 = vand.u32 4294901760, %v2571_v9  ;;  %v2588_v27 = vpack.c.bf16 %v164_v46, %v157_v45  ;;  %v2590_v28 = vpack.c.bf16 %v178_v58, %v171_v53 }
  0x3c   :  { %2033 = vmatprep.subr.bf16.mxu0 %v2421_v0  ;;  %2177 = vmatprep.subr.bf16.mxu1 %v2421_v0  ;;  %v2592_v29 = vpack.c.bf16 %v192_v8, %v185_v60  ;;  %v2595_v30 = vpack.c.bf16 %v206_v16, %v199_v15  ;;  %v2597_v33 = vpack.c.bf16 %v220_v19, %v213_v17  ;;  %v148_v39 = vand.u32 4294901760, %v147_v6 }
  0x3d   :  { %v2599_v36 = vpack.c.bf16 %v234_v21, %v227_v20  ;;  %v2601_v37 = vpack.c.bf16 %v248_v24, %v241_v23  ;;  %v2604_v38 = vpack.c.bf16 %v262_v26, %v255_v25  ;;  %v186_v40 = vsub.f32 %v2527_v48, %v185_v60 }
  0x3e   :  { %v2610_v41 = vpack.c.bf16 %v166_v11, %v159_v10  ;;  %v173_v45 = vand.u32 4294901760, %v172_v7  ;;  %v180_v46 = vand.u32 4294901760, %v179_v14  ;;  %v193_v53 = vsub.f32 %v2538_v54, %v192_v8 }
  0x3f   :  { %2035 = vmatpush3.bf16.msra.mxu0 %v2519_v44  ;;  %2179 = vmatpush3.bf16.msra.mxu1 %v2519_v44  ;;  %v200_v56 = vsub.f32 %v2540_v55, %v199_v15  ;;  %v187_v58 = vand.u32 4294901760, %v186_v40  ;;  %v207_v6 = vsub.f32 %v2546_v59, %v206_v16  ;;  %v214_v11 = vsub.f32 %v2551_v61, %v213_v17 }
  0x40   :  { %2036 = vmatprep.subr.bf16.mxu0 %v2421_v0  ;;  %2180 = vmatprep.subr.bf16.mxu1 %v2421_v0  ;;  %v2618_v57 = vpack.c.bf16 %v180_v46, %v173_v45  ;;  %v194_v60 = vand.u32 4294901760, %v193_v53  ;;  %v221_v14 = vsub.f32 %v2553_v62, %v220_v19  ;;  %v228_v15 = vsub.f32 %v2555_v63, %v227_v20 }
  0x41   :  { %v201_v7 = vand.u32 4294901760, %v200_v56  ;;  %v208_v10 = vand.u32 4294901760, %v207_v6  ;;  %v235_v45 = vsub.f32 %v2558_v2, %v234_v21  ;;  %v242_v46 = vsub.f32 %v2560_v3, %v241_v23 }
  0x42   :  { %v2625_v8 = vpack.c.bf16 %v194_v60, %v187_v58  ;;  %v222_v40 = vand.u32 4294901760, %v221_v14  ;;  %v229_v19 = vand.u32 4294901760, %v228_v15  ;;  %v249_v20 = vsub.f32 %v2562_v4, %v248_v24 }
  0x43   :  { %2038 = vmatpush3.bf16.msra.mxu0 %v2530_v49  ;;  %2182 = vmatpush3.bf16.msra.mxu1 %v2530_v49  ;;  %v2632_v16 = vpack.c.bf16 %v208_v10, %v201_v7  ;;  %v236_v53 = vand.u32 4294901760, %v235_v45  ;;  %v256_v56 = vsub.f32 %v2564_v5, %v255_v25  ;;  %v243_v21 = vand.u32 4294901760, %v242_v46 }
  0x44   :  { %2039 = vmatprep.subr.bf16.mxu0 %v2421_v0  ;;  %2183 = vmatprep.subr.bf16.mxu1 %v2421_v0  ;;  %v250_v60 = vand.u32 4294901760, %v249_v20  ;;  %v263_v23 = vsub.f32 %v2571_v9, %v262_v26  ;;  %v2659_v26 = vpack.c.bf16 %v2507_v35, %v2505_v34  ;;  %v2666_v10 = vpack.c.bf16 %v2523_v47, %v2516_v43 }
  0x45   :  { %v2644_v58 = vpack.c.bf16 %v236_v53, %v229_v19  ;;  %v257_v7 = vand.u32 4294901760, %v256_v56  ;;  %v2674_v34 = vpack.c.bf16 %v2538_v54, %v2527_v48  ;;  %v2680_v35 = vpack.c.bf16 %v2546_v59, %v2540_v55 }
  0x46   :  { %v2649_v6 = vpack.c.bf16 %v250_v60, %v243_v21  ;;  %v264_v24 = vand.u32 4294901760, %v263_v23  ;;  %v2686_v43 = vpack.c.bf16 %v2553_v62, %v2551_v61  ;;  %v2692_v47 = vpack.c.bf16 %v2558_v2, %v2555_v63 }
  0x47   :  { %2041 = vmatpush3.bf16.msra.mxu0 %v2532_v50  ;;  %2185 = vmatpush3.bf16.msra.mxu1 %v2532_v50  ;;  %v2698_v48 = vpack.c.bf16 %v2562_v4, %v2560_v3  ;;  %v2704_v54 = vpack.c.bf16 %v2571_v9, %v2564_v5  ;;  %v1396_v5 = vld [vmem:[%s2892_s3] ss:$0 sm:$0xff] }
  0x48   :  { %2042 = vmatprep.subr.bf16.mxu0 %v2421_v0  ;;  %2186 = vmatprep.subr.bf16.mxu1 %v2421_v0  ;;  %v2653_v25 = vpack.c.bf16 %v264_v24, %v257_v7 }
  0x4b   :  { %2044 = vmatpush3.bf16.msra.mxu0 %v2534_v51  ;;  %2188 = vmatpush3.bf16.msra.mxu1 %v2534_v51 }
  0x4c   :  { %2045 = vmatprep.subr.bf16.mxu0 %v2421_v0  ;;  %2189 = vmatprep.subr.bf16.mxu1 %v2421_v0 }
  0x4e   :  { %1634 = vmatmul.mubr.f32.vlgmr.msra.gmra.mrb[0].mxu0 %v148_v39  ;;  %v215_v39 = vand.u32 4294901760, %v214_v11 }
  0x4f   :  { %2047 = vmatpush3.bf16.msra.mxu0 %v2610_v41  ;;  %1668 = vmatprep.mubr.msk.f32.mxu0 %vm2422_vm0, %v2423_v1 }
  0x50   :  { %2048 = vmatprep.subr.bf16.mxu0 %v2421_v0  ;;  %v2638_v17 = vpack.c.bf16 %v222_v40, %v215_v39 }
  0x53   :  { %2050 = vmatpush3.bf16.msra.mxu0 %v2618_v57 }
  0x54   :  { %2051 = vmatprep.subr.bf16.mxu0 %v2421_v0 }
  0x57   :  { %2053 = vmatpush3.bf16.msra.mxu0 %v2625_v8 }
  0x58   :  { %2054 = vmatprep.subr.bf16.mxu0 %v2421_v0 }
  0x5b   :  { %2056 = vmatpush3.bf16.msra.mxu0 %v2632_v16 }
  0x5c   :  { %2057 = vmatprep.subr.bf16.mxu0 %v2421_v0 }
  0x5f   :  { %2059 = vmatpush3.bf16.msra.mxu0 %v2638_v17 }
  0x60   :  { %2060 = vmatprep.subr.bf16.mxu0 %v2421_v0 }
  0x63   :  { %2062 = vmatpush3.bf16.msra.mxu0 %v2644_v58 }
  0x64   :  { %2063 = vmatprep.subr.bf16.mxu0 %v2421_v0 }
  0x67   :  { %2065 = vmatpush3.bf16.msra.mxu0 %v2649_v6 }
  0x68   :  { %2066 = vmatprep.subr.bf16.mxu0 %v2421_v0 }
  0x6b   :  { %2068 = vmatpush3.bf16.msra.mxu0 %v2653_v25 }
  0x6c   :  { %2069 = vmatprep.subr.bf16.mxu0 %v2421_v0 }
  0x6e   :  { %1669 = vmatmul.mubr.f32.vlgmr.msra.gmra.mrb[0].mxu0 %v2500_v31 }
  0x6f   :  { %2071 = vmatpush3.bf16.msra.mxu0 %v2659_v26  ;;  %1703 = vmatprep.mubr.msk.f32.mxu0 %vm2422_vm0, %v2423_v1 }
  0x70   :  { %2072 = vmatprep.subr.bf16.mxu0 %v2421_v0 }
  0x73   :  { %2074 = vmatpush3.bf16.msra.mxu0 %v2666_v10 }
  0x74   :  { %2075 = vmatprep.subr.bf16.mxu0 %v2421_v0 }
  0x77   :  { %2077 = vmatpush3.bf16.msra.mxu0 %v2674_v34 }
  0x78   :  { %2078 = vmatprep.subr.bf16.mxu0 %v2421_v0 }
  0x7b   :  { %2080 = vmatpush3.bf16.msra.mxu0 %v2680_v35 }
  0x7c   :  { %2081 = vmatprep.subr.bf16.mxu0 %v2421_v0 }
  0x7f   :  { %2083 = vmatpush3.bf16.msra.mxu0 %v2686_v43 }
  0x80   :  { %2084 = vmatprep.subr.bf16.mxu0 %v2421_v0 }
  0x83   :  { %2086 = vmatpush3.bf16.msra.mxu0 %v2692_v47 }
  0x84   :  { %2087 = vmatprep.subr.bf16.mxu0 %v2421_v0 }
  0x87   :  { %2089 = vmatpush3.bf16.msra.mxu0 %v2698_v48 }
  0x88   :  { %2090 = vmatprep.subr.bf16.mxu0 %v2421_v0 }
  0x8b   :  { %2092 = vmatpush3.bf16.msra.mxu0 %v2704_v54 }
  0x8c   :  { %2093 = vmatprep.subr.bf16.mxu0 %v2421_v0 }
  0x8e   :  { %1704 = vmatmul.mubr.f32.vlgmr.msra.gmra.mrb[0].mxu0 %v2514_v42 }
  0x8f   :  { %2095 = vmatpush3.bf16.msra.mxu0 %v2483_v12  ;;  %1738 = vmatprep.mubr.msk.f32.mxu0 %vm2422_vm0, %v2423_v1 }
  0x90   :  { %2096 = vmatprep.subr.bf16.mxu0 %v2421_v0 }
  0x93   :  { %2098 = vmatpush3.bf16.msra.mxu0 %v2486_v13 }
  0x94   :  { %2099 = vmatprep.subr.bf16.mxu0 %v2421_v0 }
  0x97   :  { %2101 = vmatpush3.bf16.msra.mxu0 %v2492_v18 }
  0x98   :  { %2102 = vmatprep.subr.bf16.mxu0 %v2421_v0 }
  0x9b   :  { %2104 = vmatpush3.bf16.msra.mxu0 %v2503_v32 }
  0x9c   :  { %2105 = vmatprep.subr.bf16.mxu0 %v2421_v0 }
  0x9f   :  { %2107 = vmatpush3.bf16.msra.mxu0 %v2519_v44 }
  0xa0   :  { %2108 = vmatprep.subr.bf16.mxu0 %v2421_v0 }
  0xa3   :  { %2110 = vmatpush3.bf16.msra.mxu0 %v2530_v49 }
  0xa4   :  { %2111 = vmatprep.subr.bf16.mxu0 %v2421_v0 }
  0xa7   :  { %2113 = vmatpush3.bf16.msra.mxu0 %v2532_v50 }
  0xa8   :  { %2114 = vmatprep.subr.bf16.mxu0 %v2421_v0 }
  0xab   :  { %2116 = vmatpush3.bf16.msra.mxu0 %v2534_v51 }
  0xac   :  { %2117 = vmatprep.subr.bf16.mxu0 %v2421_v0 }
  0xae   :  { %1739 = vmatmul.mubr.f32.vlgmr.msra.gmra.mrb[0].mxu0 %v146_v52 }
  0xaf   :  { %2119 = vmatpush3.bf16.msra.mxu0 %v2588_v27  ;;  %1773 = vmatprep.mubr.msk.f32.mxu0 %vm2422_vm0, %v2423_v1 }
  0xb0   :  { %2120 = vmatprep.subr.bf16.mxu0 %v2421_v0 }
  0xb3   :  { %2122 = vmatpush3.bf16.msra.mxu0 %v2590_v28 }
  0xb4   :  { %2123 = vmatprep.subr.bf16.mxu0 %v2421_v0 }
  0xb7   :  { %2125 = vmatpush3.bf16.msra.mxu0 %v2592_v29 }
  0xb8   :  { %2126 = vmatprep.subr.bf16.mxu0 %v2421_v0 }
  0xbb   :  { %2128 = vmatpush3.bf16.msra.mxu0 %v2595_v30 }
  0xbc   :  { %2129 = vmatprep.subr.bf16.mxu0 %v2421_v0 }
  0xbf   :  { %2131 = vmatpush3.bf16.msra.mxu0 %v2597_v33 }
  0xc0   :  { %2132 = vmatprep.subr.bf16.mxu0 %v2421_v0 }
  0xc3   :  { %2134 = vmatpush3.bf16.msra.mxu0 %v2599_v36 }
  0xc4   :  { %2135 = vmatprep.subr.bf16.mxu0 %v2421_v0 }
  0xc7   :  { %2137 = vmatpush3.bf16.msra.mxu0 %v2601_v37 }
  0xc8   :  { %2138 = vmatprep.subr.bf16.mxu0 %v2421_v0 }
  0xcb   :  { %2140 = vmatpush3.bf16.msra.mxu0 %v2604_v38 }
  0xcc   :  { %2141 = vmatprep.subr.bf16.mxu0 %v2421_v0 }
  0xce   :  { %1774 = vmatmul.mubr.f32.vlgmr.msra.gmra.mrb[0].mxu0 %v2500_v31 }
  0xcf   :  { %2143 = vmatpush3.bf16.msra.mxu0 %v2483_v12  ;;  %1808 = vmatprep.mubr.msk.f32.mxu0 %vm2422_vm0, %v2423_v1 }
  0xd0   :  { %2144 = vmatprep.subr.bf16.mxu0 %v2421_v0 }
  0xd3   :  { %2146 = vmatpush3.bf16.msra.mxu0 %v2486_v13 }
  0xd4   :  { %2147 = vmatprep.subr.bf16.mxu0 %v2421_v0 }
  0xd7   :  { %2149 = vmatpush3.bf16.msra.mxu0 %v2492_v18 }
  0xd8   :  { %2150 = vmatprep.subr.bf16.mxu0 %v2421_v0 }
  0xdb   :  { %2152 = vmatpush3.bf16.msra.mxu0 %v2503_v32 }
  0xdc   :  { %2153 = vmatprep.subr.bf16.mxu0 %v2421_v0 }
  0xdf   :  { %2155 = vmatpush3.bf16.msra.mxu0 %v2519_v44 }
  0xe0   :  { %2156 = vmatprep.subr.bf16.mxu0 %v2421_v0 }
  0xe3   :  { %2158 = vmatpush3.bf16.msra.mxu0 %v2530_v49 }
  0xe4   :  { %2159 = vmatprep.subr.bf16.mxu0 %v2421_v0 }
  0xe7   :  { %2161 = vmatpush3.bf16.msra.mxu0 %v2532_v50 }
  0xe8   :  { %2162 = vmatprep.subr.bf16.mxu0 %v2421_v0 }
  0xeb   :  { %2164 = vmatpush3.bf16.msra.mxu0 %v2534_v51 }
  0xee   :  { %1809 = vmatmul.mubr.f32.vlgmr.msra.gmra.mrb[0].mxu0 %v2500_v31 }
 0x1c1   :  { %v700_v42 = vpop.f32.mrb[0].mxu0 }
 0x1c2   :  { %v704_v52 = vmul.f32 0.03125, %v700_v42  ;;  %v1810_v55 = vpop.f32.mrb[1].mxu0 }
 0x1c4   :  { %v2768_v59 = vsub.f32 %v2494_v22, %v704_v52 }
 0x1c6   :  { %v706_v61 = vmul.f32 %v2768_v59, %v2768_v59 }
 0x1c8   :  { %v2772_v62 = vand.u32 4294901760, %v706_v61 }
 0x1ca   :  { %v789_v63 = vsub.f32 %v706_v61, %v2772_v62 }
 0x1cc   :  { %v790_v2 = vand.u32 4294901760, %v789_v63 }
 0x1ce   :  { %v791_v3 = vsub.f32 %v789_v63, %v790_v2 }
 0x1d0   :  { %v792_v4 = vand.u32 4294901760, %v791_v3 }
 0x1d2   :  { %1844 = vmatmul.mubr.f32.vlgmr.msra.gmra.mrb[0].mxu1 %v792_v4 }
 0x1d3   :  { %2191 = vmatpush3.bf16.msra.mxu1 %v2610_v41  ;;  %1878 = vmatprep.mubr.msk.f32.mxu1 %vm2422_vm0, %v2423_v1 }
 0x1d4   :  { %2192 = vmatprep.subr.bf16.mxu1 %v2421_v0 }
 0x1d7   :  { %2194 = vmatpush3.bf16.msra.mxu1 %v2618_v57 }
 0x1d8   :  { %2195 = vmatprep.subr.bf16.mxu1 %v2421_v0 }
 0x1db   :  { %2197 = vmatpush3.bf16.msra.mxu1 %v2625_v8 }
 0x1dc   :  { %2198 = vmatprep.subr.bf16.mxu1 %v2421_v0 }
 0x1df   :  { %2200 = vmatpush3.bf16.msra.mxu1 %v2632_v16 }
 0x1e0   :  { %2201 = vmatprep.subr.bf16.mxu1 %v2421_v0 }
 0x1e3   :  { %2203 = vmatpush3.bf16.msra.mxu1 %v2638_v17 }
 0x1e4   :  { %2204 = vmatprep.subr.bf16.mxu1 %v2421_v0 }
 0x1e7   :  { %2206 = vmatpush3.bf16.msra.mxu1 %v2644_v58 }
 0x1e8   :  { %2207 = vmatprep.subr.bf16.mxu1 %v2421_v0 }
 0x1eb   :  { %2209 = vmatpush3.bf16.msra.mxu1 %v2649_v6 }
 0x1ec   :  { %2210 = vmatprep.subr.bf16.mxu1 %v2421_v0 }
 0x1ef   :  { %2212 = vmatpush3.bf16.msra.mxu1 %v2653_v25 }
 0x1f0   :  { %2213 = vmatprep.subr.bf16.mxu1 %v2421_v0 }
 0x1f2   :  { %1879 = vmatmul.mubr.f32.vlgmr.msra.gmra.mrb[0].mxu1 %v2772_v62 }
 0x1f3   :  { %2215 = vmatpush3.bf16.msra.mxu1 %v2659_v26  ;;  %1913 = vmatprep.mubr.msk.f32.mxu1 %vm2422_vm0, %v2423_v1 }
 0x1f4   :  { %2216 = vmatprep.subr.bf16.mxu1 %v2421_v0 }
 0x1f7   :  { %2218 = vmatpush3.bf16.msra.mxu1 %v2666_v10 }
 0x1f8   :  { %2219 = vmatprep.subr.bf16.mxu1 %v2421_v0 }
 0x1fb   :  { %2221 = vmatpush3.bf16.msra.mxu1 %v2674_v34 }
 0x1fc   :  { %2222 = vmatprep.subr.bf16.mxu1 %v2421_v0 }
 0x1ff   :  { %2224 = vmatpush3.bf16.msra.mxu1 %v2680_v35 }
 0x200   :  { %2225 = vmatprep.subr.bf16.mxu1 %v2421_v0 }
 0x203   :  { %2227 = vmatpush3.bf16.msra.mxu1 %v2686_v43 }
 0x204   :  { %2228 = vmatprep.subr.bf16.mxu1 %v2421_v0 }
 0x207   :  { %2230 = vmatpush3.bf16.msra.mxu1 %v2692_v47 }
 0x208   :  { %2231 = vmatprep.subr.bf16.mxu1 %v2421_v0 }
 0x20b   :  { %2233 = vmatpush3.bf16.msra.mxu1 %v2698_v48 }
 0x20c   :  { %2234 = vmatprep.subr.bf16.mxu1 %v2421_v0 }
 0x20f   :  { %2236 = vmatpush3.bf16.msra.mxu1 %v2704_v54 }
 0x210   :  { %2237 = vmatprep.subr.bf16.mxu1 %v2421_v0 }
 0x212   :  { %1914 = vmatmul.mubr.f32.vlgmr.msra.gmra.mrb[0].mxu1 %v789_v63 }
 0x213   :  { %2239 = vmatpush3.bf16.msra.mxu1 %v2483_v12  ;;  %1948 = vmatprep.mubr.msk.f32.mxu1 %vm2422_vm0, %v2423_v1 }
 0x214   :  { %2240 = vmatprep.subr.bf16.mxu1 %v2421_v0 }
 0x217   :  { %2242 = vmatpush3.bf16.msra.mxu1 %v2486_v13 }
 0x218   :  { %2243 = vmatprep.subr.bf16.mxu1 %v2421_v0 }
 0x21b   :  { %2245 = vmatpush3.bf16.msra.mxu1 %v2492_v18 }
 0x21c   :  { %2246 = vmatprep.subr.bf16.mxu1 %v2421_v0 }
 0x21f   :  { %2248 = vmatpush3.bf16.msra.mxu1 %v2503_v32 }
 0x220   :  { %2249 = vmatprep.subr.bf16.mxu1 %v2421_v0 }
 0x223   :  { %2251 = vmatpush3.bf16.msra.mxu1 %v2519_v44 }
 0x224   :  { %2252 = vmatprep.subr.bf16.mxu1 %v2421_v0 }
 0x227   :  { %2254 = vmatpush3.bf16.msra.mxu1 %v2530_v49 }
 0x228   :  { %2255 = vmatprep.subr.bf16.mxu1 %v2421_v0 }
 0x22b   :  { %2257 = vmatpush3.bf16.msra.mxu1 %v2532_v50 }
 0x22c   :  { %2258 = vmatprep.subr.bf16.mxu1 %v2421_v0 }
 0x22f   :  { %2260 = vmatpush3.bf16.msra.mxu1 %v2534_v51 }
 0x230   :  { %2261 = vmatprep.subr.bf16.mxu1 %v2421_v0 }
 0x232   :  { %1949 = vmatmul.mubr.f32.vlgmr.msra.gmra.mrb[0].mxu1 %v790_v2 }
 0x233   :  { %2263 = vmatpush3.bf16.msra.mxu1 %v2588_v27  ;;  %1983 = vmatprep.mubr.msk.f32.mxu1 %vm2422_vm0, %v2423_v1 }
 0x234   :  { %2264 = vmatprep.subr.bf16.mxu1 %v2421_v0 }
 0x237   :  { %2266 = vmatpush3.bf16.msra.mxu1 %v2590_v28 }
 0x238   :  { %2267 = vmatprep.subr.bf16.mxu1 %v2421_v0 }
 0x23b   :  { %2269 = vmatpush3.bf16.msra.mxu1 %v2592_v29 }
 0x23c   :  { %2270 = vmatprep.subr.bf16.mxu1 %v2421_v0 }
 0x23f   :  { %2272 = vmatpush3.bf16.msra.mxu1 %v2595_v30 }
 0x240   :  { %2273 = vmatprep.subr.bf16.mxu1 %v2421_v0 }
 0x243   :  { %2275 = vmatpush3.bf16.msra.mxu1 %v2597_v33 }
 0x244   :  { %2276 = vmatprep.subr.bf16.mxu1 %v2421_v0 }
 0x247   :  { %2278 = vmatpush3.bf16.msra.mxu1 %v2599_v36 }
 0x248   :  { %2279 = vmatprep.subr.bf16.mxu1 %v2421_v0 }
 0x24b   :  { %2281 = vmatpush3.bf16.msra.mxu1 %v2601_v37 }
 0x24c   :  { %2282 = vmatprep.subr.bf16.mxu1 %v2421_v0 }
 0x24f   :  { %2284 = vmatpush3.bf16.msra.mxu1 %v2604_v38 }
 0x250   :  { %2285 = vmatprep.subr.bf16.mxu1 %v2421_v0 }
 0x252   :  { %1984 = vmatmul.mubr.f32.vlgmr.msra.gmra.mrb[0].mxu1 %v2772_v62 }
 0x253   :  { %2287 = vmatpush3.bf16.msra.mxu1 %v2483_v12  ;;  %2018 = vmatprep.mubr.msk.f32.mxu1 %vm2422_vm0, %v2423_v1 }
 0x254   :  { %2288 = vmatprep.subr.bf16.mxu1 %v2421_v0 }
 0x257   :  { %2290 = vmatpush3.bf16.msra.mxu1 %v2486_v13 }
 0x258   :  { %2291 = vmatprep.subr.bf16.mxu1 %v2421_v0 }
 0x25b   :  { %2293 = vmatpush3.bf16.msra.mxu1 %v2492_v18 }
 0x25c   :  { %2294 = vmatprep.subr.bf16.mxu1 %v2421_v0 }
 0x25f   :  { %2296 = vmatpush3.bf16.msra.mxu1 %v2503_v32 }
 0x260   :  { %2297 = vmatprep.subr.bf16.mxu1 %v2421_v0 }
 0x263   :  { %2299 = vmatpush3.bf16.msra.mxu1 %v2519_v44 }
 0x264   :  { %2300 = vmatprep.subr.bf16.mxu1 %v2421_v0 }
 0x267   :  { %2302 = vmatpush3.bf16.msra.mxu1 %v2530_v49 }
 0x268   :  { %2303 = vmatprep.subr.bf16.mxu1 %v2421_v0 }
 0x26b   :  { %2305 = vmatpush3.bf16.msra.mxu1 %v2532_v50 }
 0x26c   :  { %2306 = vmatprep.subr.bf16.mxu1 %v2421_v0  ;;  %v1395_v0 = vld [vmem:[%s2891_s2] ss:$0 sm:$0xff] }
 0x26f   :  { %2308 = vmatpush3.bf16.msra.mxu1 %v2534_v51 }
 0x272   :  { %2019 = vmatmul.mubr.f32.vlgmr.msra.gmra.mrb[0].mxu1 %v2772_v62 }
 0x345   :  { %v1344_v1 = vpop.f32.mrb[0].mxu1 }
 0x346   :  { %v1348_v12 = vmul.f32 0.032258064, %v1344_v1  ;;  %v2020_v13 = vpop.f32.mrb[1].mxu1 }
 0x348   :  { %2339 = vrsqrt.f32 %v1348_v12  ;;  %vm1351_vm1 = vcmp.eq.f32.partialorder %v1348_v12, inf  ;;  %v1354_v31 = vand.u32 2147483648, %v1348_v12  ;;  %vm1353_vm2 = vcmp.eq.f32.partialorder %v1348_v12, 0.0 }
 0x352   :  { %v2340_v18 = vpop.eup %2339 }
 0x353   :  { %v1350_v22 = vmul.f32 %v2340_v18, %v1348_v12 }
 0x355   :  { %v1352_v32 = vsel %vm1351_vm1, %v1348_v12, %v1350_v22 }
 0x356   :  { %v1355_v44 = vsel %vm1353_vm2, %v1354_v31, %v1352_v32 }
 0x357   :  { %v1356_v49 = vadd.f32 0.001, %v1355_v44 }
 0x359   :  { %2341 = vrcp.f32 %v1356_v49 }
 0x363   :  { %v2342_v50 = vpop.eup %2341 }
 0x364   :  { %v1359_v51 = vmul.f32 %v2342_v50, %v2768_v59 }
 0x366   :  { %v1367_v9 = vmul.f32 %v1395_v0, %v1359_v51 }
 0x368   :  { %v1375_v27 = vadd.f32 %v1396_v5, %v1367_v9 }
 0x36a   :  { %1376 = vst [vmem:[#allocation7] sm:$0xff] %v1375_v27 }
 0x36b   :  { %1381 = vsyncadd [#allocation4], 64  ;;  %s2424_s20 = smov [#allocation7]  }
 0x36c   :  { %s1382_s21 = sshll.u32 %s2424_s20, 4  ;;  %s1383_s21 = int_to_ptr.vmem [resolvable:$true] %s1382_s21 }
 0x36d   :  { %s2387_s22 = scalar_lea.vmem %s1383_s21, 64  ;;  %s2391_s23 = scalar_lea.vmem %s1383_s21, 128 }
 0x36e   :  { %p2388_p2 = scmp.ne.s32.totalorder %s1383_s21, %s2387_s22  ;;  %p2392_p3 = scmp.lt.s32.totalorder %s1383_s21, %s1383_s21 }
 0x36f   :  { %p2393_p4 = scmp.lt.s32.totalorder %s2391_s23, %s2387_s22 }
 0x371   :  { %p2394_p5 = por %p2393_p4, %p2392_p3 }
 0x373   :  { %p2395_p6 = pnand %p2394_p5, %p2388_p2 }
 0x375   :  { %2398 = shalt.err (!%p2395_p6)
}
 0x376   :  { %s2399_s25 = scalar_lea.hbm %s2893_s4, 64 }
 0x377   :  { %p2400_p7 = scmp.ne.s32.totalorder %s2893_s4, %s2399_s25  ;;  %p2403_p8 = scmp.lt.u32.totalorder %s2399_s25, %s2893_s4 }
 0x379   :  { %p2405_p9 = pnand %p2403_p8, %p2400_p7 }
 0x37b   :  { %2408 = shalt.err (!%p2405_p9)
}
 0x37c   :  { %1388 = dma.vmem_to_hbm [thread:$0]  %s1383_s21, 64, %s2893_s4, [#allocation4], %s2416_s26, %s2416_s26, %s2417_s27  }
 0x37d   :  { %2413 = dma.done.wait [#allocation4], 128  }
 0x37e   :  { %2414 = vsyncadd [#allocation4], 4294967168 }
 0x37f   :  { %1392 = vsyncpa [#allocation3], 1 }
 0x380   :  { %1393 = vsyncpa [#allocation6], 1 }
 0x381   :  { %1394 = vsyncpa [#allocation4], 1 }

</bundles_post_ra>
